<compile_context>
chip_gen: v7x
topology: tpu7x:2x2x1
jax: 0.10.0
libtpu: 0.0.40
codegen_flags: <defaults>
</compile_context>

<pallas_src>
import math

import jax
import jax.numpy as jnp
from jax.experimental import pallas as pl
from jax.experimental.pallas import tpu as pltpu


# ---------------------------------------------------------------------------
# Kernel: identity copy of one lane-dense (tile_rows, lanes) VMEM tile.
# ---------------------------------------------------------------------------
def _copy_kernel(x_ref, o_ref):
    o_ref[...] = x_ref[...]


# ---------------------------------------------------------------------------
# torch.Tensor.view shape resolution for (batch, *shape), including -1.
# ---------------------------------------------------------------------------
def _resolve_view_shape(batch, in_numel_per_batch, shape):
    shape = tuple(int(s) for s in shape)
    if shape.count(-1) > 1:
        raise ValueError("only one dimension can be inferred (-1)")
    if -1 in shape:
        known = 1
        for s in shape:
            if s != -1:
                known *= s
        if known == 0 or in_numel_per_batch % known != 0:
            raise ValueError(
                f"shape {(batch,) + shape} is invalid for input with "
                f"{batch * in_numel_per_batch} elements"
            )
        shape = tuple(in_numel_per_batch // known if s == -1 else s for s in shape)
    if math.prod(shape) != in_numel_per_batch:
        raise ValueError(
            f"shape {(batch,) + shape} is invalid for input with "
            f"{batch * in_numel_per_batch} elements"
        )
    return (batch,) + shape


# ---------------------------------------------------------------------------
# Tiling plan: pick (rows, lanes, tile_rows) so that
#   * lanes is a multiple of 128 (lane-dense, unmasked vst),
#   * rows and tile_rows are multiples of 8 (sublane aligned),
#   * one block is <= ~2 MiB (fits all generations' scoped VMEM with
#     in+out double buffering).
# Returns None if `total` cannot be laid out lane-dense.
# ---------------------------------------------------------------------------
_MAX_BLOCK_BYTES = 2 * 1024 * 1024


def _plan_tiles(total, itemsize):
    for lanes in (2048, 1024, 512, 256, 128):
        if total % lanes:
            continue
        rows = total // lanes
        if rows % 8:
            continue
        max_tr = max(8, min(512, _MAX_BLOCK_BYTES // (lanes * itemsize)))
        max_tr = (max_tr // 8) * 8
        tr = min(rows, max_tr)
        while tr > 8 and rows % tr:
            tr -= 8
        if rows % tr:
            tr = 8
        return rows, lanes, tr
    return None


# ---------------------------------------------------------------------------
# Tiled, pipelined HBM->HBM copy through VMEM (only used when a materialized
# copy is requested).
# ---------------------------------------------------------------------------
def _pallas_copy_flat(x):
    total = math.prod(x.shape)
    itemsize = jnp.dtype(x.dtype).itemsize
    plan = _plan_tiles(total, itemsize)

    if plan is None:
        # Small / oddly-sized fallback: single full-extent block (allowed by
        # the (8,128) rule because block == full array dims).  Only taken for
        # tiny arrays; anything large is lane-dense in practice.
        if total * itemsize > 8 * 1024 * 1024:
            # TODO(synk): pad-and-strip path for huge non-128-divisible totals;
            # a view never needs a copy, so fall back to metadata reshape.
            return jnp.reshape(x, (total,))
        x2d = jnp.reshape(x, (1, total))
        out = pl.pallas_call(
            _copy_kernel,
            out_shape=jax.ShapeDtypeStruct((1, total), x.dtype),
            grid=(1,),
            in_specs=[pl.BlockSpec((1, total), lambda i: (0, 0))],
            out_specs=pl.BlockSpec((1, total), lambda i: (0, 0)),
            compiler_params=pltpu.CompilerParams(
                dimension_semantics=("arbitrary",)
            ),
        )(x2d)
        return jnp.reshape(out, (total,))

    rows, lanes, tile_rows = plan
    x2d = jnp.reshape(x, (rows, lanes))
    out = pl.pallas_call(
        _copy_kernel,
        out_shape=jax.ShapeDtypeStruct((rows, lanes), x.dtype),
        grid=(rows // tile_rows,),
        in_specs=[pl.BlockSpec((tile_rows, lanes), lambda i: (i, 0))],
        out_specs=pl.BlockSpec((tile_rows, lanes), lambda i: (i, 0)),
        compiler_params=pltpu.CompilerParams(
            dimension_semantics=("parallel",)  # shard tiles across v7x's 2 TCs
        ),
    )(x2d)
    return jnp.reshape(out, (total,))


# ---------------------------------------------------------------------------
# Public wrapper: JAX/Pallas equivalent of ViewLayer(*shape)(x).
# ---------------------------------------------------------------------------
def view_layer(x, *shape, materialize=False):
    batch = x.shape[0]
    n = math.prod(x.shape[1:]) if x.ndim > 1 else 1
    target_shape = _resolve_view_shape(batch, n, shape)

    if not materialize:
        # Fast path (matches torch .view semantics): reshape of a contiguous
        # row-major array is metadata-only in XLA — no HBM traffic, no kernel.
        return jnp.reshape(x, target_shape)

    # Materialized copy path: tiled, lane-dense, double-buffered Pallas copy.
    flat = _pallas_copy_flat(x)
    return jnp.reshape(flat, target_shape)


if __name__ == "__main__":
    key = jax.random.PRNGKey(0)
    # Small NCHW-like feature map consistent with discriminator_v5 usage.
    x = jax.random.normal(key, (2, 4, 16, 16), dtype=jnp.float32)

    # --- Fast path: ViewLayer(-1) (flatten all but batch), metadata only. ---
    y_flat = view_layer(x, -1)
    jax.block_until_ready(y_flat)
    assert y_flat.shape == (2, 4 * 16 * 16)
    assert jnp.array_equal(y_flat, jnp.reshape(x, (2, -1)))

    # --- Pallas path: same op but with a materialized (tiled) copy. ---------
    y_flat_copy = view_layer(x, -1, materialize=True)
    jax.block_until_ready(y_flat_copy)
    assert y_flat_copy.shape == (2, 4 * 16 * 16)
    assert jnp.array_equal(y_flat_copy, jnp.reshape(x, (2, -1)))

    # --- ViewLayer(4, 16, 16): flat feature vector back to a map. -----------
    x_flat = jax.random.normal(jax.random.PRNGKey(1), (2, 1024), dtype=jnp.float32)
    y_map = view_layer(x_flat, 4, 16, 16, materialize=True)
    jax.block_until_ready(y_map)
    assert y_map.shape == (2, 4, 16, 16)
    assert jnp.array_equal(y_map, jnp.reshape(x_flat, (2, 4, 16, 16)))

    print("KERNEL_OK")
</pallas_src>

<mosaic_0001>
module attributes {stable_mosaic.version = 11 : i64} {
  func.func @_copy_kernel(%arg0: i32, %arg1: memref<8x256xf32, #tpu.memory_space<vmem>>, %arg2: memref<8x256xf32, #tpu.memory_space<vmem>>) attributes {dimension_semantics = [#tpu.dimension_semantics<parallel>], iteration_bounds = array<i64: 1>, scalar_prefetch = 0 : i64, scratch_operands = 0 : i64, tpu.core_type = #tpu.core_type<tc>, window_params = [{transform_indices = @transform_0, window_bounds = array<i64: 8, 256>}, {transform_indices = @transform_1, window_bounds = array<i64: 8, 256>}]} {
    %c0 = arith.constant 0 : index
    %c0_0 = arith.constant 0 : index
    %0 = vector.load %arg1[%c0, %c0_0] : memref<8x256xf32, #tpu.memory_space<vmem>>, vector<8x256xf32>
    %c0_1 = arith.constant 0 : index
    %c0_2 = arith.constant 0 : index
    %1 = vector.load %arg2[%c0_1, %c0_2] : memref<8x256xf32, #tpu.memory_space<vmem>>, vector<8x256xf32>
    tpu.vector_store %arg2[%c0_1, %c0_2], %0 {strides = array<i32>} : memref<8x256xf32, #tpu.memory_space<vmem>>, vector<8x256xf32>,
    return
  }
  func.func @transform_0(%arg0: i32) -> (i32, i32) {
    %c0_i32 = arith.constant 0 : i32
    %c0_i32_0 = arith.constant 0 : i32
    return %arg0, %c0_i32 : i32, i32
  }
  func.func @transform_1(%arg0: i32) -> (i32, i32) {
    %c0_i32 = arith.constant 0 : i32
    %c0_i32_0 = arith.constant 0 : i32
    return %arg0, %c0_i32 : i32, i32
  }
}

</mosaic_0001>

<bundles_post_ra>
// kernel: tpu_custom_call.1
= control target key start
LH: loop header
LB: loop body
LE: loop exit
PB: predicated region body
PF: predicated region fallthrough
CT: control target
= control target key end

     0   :  { %6 = vsyncpa [#allocation3], 0  ;;  %s126_s0 = inlined_call_operand.hbm [shape: f32[8,256], index: 0, kind: input, shape index: {}]   ;;  %s127_s1 = inlined_call_operand.hbm [shape: f32[8,256], index: 1, kind: output, shape index: {}]  }
   0x1   :  { %7 = vsyncpa [#allocation4], 0  ;;  %s90_s6 = smov [#allocation2]   ;;  %s42_s10 = scalar_lea.hbm %s126_s0, 256 }
   0x2   :  { %s14_s7 = sshll.u32 %s90_s6, 4  ;;  %p43_p0 = scmp.ne.s32.totalorder %s126_s0, %s42_s10  ;;  %s15_s7 = int_to_ptr.vmem [resolvable:$true] %s14_s7 }
   0x3   :  { %p46_p1 = scmp.lt.u32.totalorder %s42_s10, %s126_s0 }
   0x5   :  { %p48_p2 = pnand %p46_p1, %p43_p0 }
   0x7   :  { %51 = shalt.err (!%p48_p2)
}
   0x8   :  { %s52_s15 = scalar_lea.vmem %s15_s7, 256  ;;  %p57_p4 = scmp.lt.s32.totalorder %s15_s7, %s15_s7 }
   0x9   :  { %p53_p3 = scmp.ne.s32.totalorder %s15_s7, %s52_s15  ;;  %p58_p5 = scmp.lt.s32.totalorder %s52_s15, %s52_s15 }
   0xb   :  { %p59_p6 = por %p58_p5, %p57_p4 }
   0xd   :  { %p60_p7 = pnand %p59_p6, %p53_p3 }
   0xf   :  { %63 = shalt.err (!%p60_p7)
}
  0x10   :  { %17 = dma.hbm_to_vmem [thread:$0]  %s126_s0, 256, %s15_s7, [#allocation3]  }
  0x11   :  { %86 = dma.done.wait [#allocation3], 256  }
  0x12   :  { %87 = vsyncadd [#allocation3], 4294967040  ;;  %s91_s18 = smov [#allocation5]   ;;  %v21_v0 = vld [vmem:[#allocation2] sm:$0xff]  ;;  %v22_v1 = vld [vmem:[#allocation2 + $0x8] sm:$0xff] }
  0x13   :  { %s31_s19 = sshll.u32 %s91_s18, 4  ;;  %23 = vst [vmem:[#allocation5] sm:$0xff] %v21_v0  ;;  %24 = vst [vmem:[#allocation5 + $0x8] sm:$0xff] %v22_v1  ;;  %s32_s19 = int_to_ptr.vmem [resolvable:$true] %s31_s19 }
  0x14   :  { %s64_s20 = scalar_lea.vmem %s32_s19, 256  ;;  %p69_p9 = scmp.lt.s32.totalorder %s32_s19, %s32_s19 }
  0x15   :  { %p65_p8 = scmp.ne.s32.totalorder %s32_s19, %s64_s20  ;;  %p70_p10 = scmp.lt.s32.totalorder %s64_s20, %s64_s20 }
  0x17   :  { %p71_p11 = por %p70_p10, %p69_p9 }
  0x19   :  { %p72_p12 = pnand %p71_p11, %p65_p8 }
  0x1b   :  { %75 = shalt.err (!%p72_p12)
}
  0x1c   :  { %s76_s0 = scalar_lea.hbm %s127_s1, 256 }
  0x1d   :  { %p77_p13 = scmp.ne.s32.totalorder %s127_s1, %s76_s0  ;;  %p80_p0 = scmp.lt.u32.totalorder %s76_s0, %s127_s1 }
  0x1f   :  { %p82_p1 = pnand %p80_p0, %p77_p13 }
  0x21   :  { %85 = shalt.err (!%p82_p1)
}
  0x22   :  { %34 = dma.vmem_to_hbm [thread:$0]  %s32_s19, 256, %s127_s1, [#allocation4]  }
  0x23   :  { %88 = dma.done.wait [#allocation4], 256  }
  0x24   :  { %89 = vsyncadd [#allocation4], 4294967040 }
  0x25   :  { %38 = vsyncpa [#allocation3], 1 }
  0x26   :  { %39 = vsyncpa [#allocation4], 1 }

</bundles_post_ra>
